<compile_context>
chip_gen: v6e
topology: v6e:2x2x1
jax: 0.10.0
libtpu: 0.0.40
codegen_flags: <defaults>
</compile_context>

<pallas_src>
import functools

import jax
import jax.numpy as jnp
from jax.experimental import pallas as pl
from jax.experimental.pallas import tpu as pltpu


def _round_up(x, m):
    return ((x + m - 1) // m) * m


def _vmem_limit_bytes():
    """Per-generation scoped-VMEM budget: v4/v5e/v6e have 128 MiB physical VMEM,
    v7x only 64 MiB per TensorCore. Unknown chips get the conservative limit."""
    try:
        kind = jax.devices()[0].device_kind.lower()
    except Exception:
        kind = ""
    if any(t in kind for t in ("v4", "v5", "v6")):
        return 96 * 1024 * 1024
    return 48 * 1024 * 1024


def _truncated_loss_kernel(logits_ref, targets_ref, w_ref, out_ref, *, q, n_rows):
    """One (TN, C) row-tile -> one partial sum of (w/q) * softmax(x)[target]**q.

    The logits-independent affine part of the loss is hoisted into JAX glue."""
    i = pl.program_id(0)
    x = logits_ref[...]                                   # (TN, C) original dtype
    tn, c = x.shape

    # Row max + one-hot target-logit extraction on the ORIGINAL dtype
    # (packed bf16 -> 2 rows per vreg; bit-identical to doing it in f32).
    m = jnp.max(x, axis=1, keepdims=True).astype(jnp.float32)            # (TN, 1)
    t = targets_ref[...]                                                 # (TN, 1) i32
    cid = jax.lax.broadcasted_iota(jnp.int32, (1, c), 1)                 # (1, C)
    zero = jnp.zeros((), dtype=x.dtype)
    logit_t = jnp.sum(jnp.where(cid == t, x, zero), axis=1,
                      keepdims=True).astype(jnp.float32)                 # (TN, 1)

    # f32 only for the exp / log-sum-exp chain (EUP + XLU); no softmax tensor.
    xf = x.astype(jnp.float32)
    s = jnp.sum(jnp.exp(xf - m), axis=1, keepdims=True)                  # (TN, 1)

    # Yg**q = exp(q * (logit_t - m - log(sum exp)))
    yg_q = jnp.exp(q * (logit_t - m - jnp.log(s)))                       # (TN, 1)

    contrib = w_ref[...] * yg_q     # w already carries the 1/q (and alpha) factors

    # Ragged last tile: SELECT away rows past the true batch size (garbage rows
    # in a partial block may contain inf/NaN; 0*NaN would poison a multiply-mask).
    rid = i * tn + jax.lax.broadcasted_iota(jnp.int32, (tn, 1), 0)
    contrib = jnp.where(rid < n_rows, contrib, 0.0)

    # Lane-dense per-tile partial (broadcast scalar across the (1,1,128) block).
    out_ref[...] = jnp.zeros_like(out_ref) + jnp.sum(contrib)


class TruncatedLossPallas:
    """Pallas/TPU re-implementation of TruncatedLoss.forward (size_average=True).

    weight = ones((trainset_size, 1), f32) matches the nn.Parameter init. The
    alpha branch is folded into the per-sample weight (exact: both scale the
    whole per-sample loss)."""

    def __init__(self, q=0.7, k=0.5, trainset_size=50000, size_average=True,
                 smooth_ratio=1.0, alpha=None):
        self.q = float(q)
        self.k = float(k)
        self.size_average = size_average
        self.smooth_ratio = float(smooth_ratio)
        self.weight = jnp.ones((trainset_size, 1), dtype=jnp.float32)
        if alpha is None:
            self.alpha = None
        elif isinstance(alpha, (float, int)):
            self.alpha = jnp.asarray([float(alpha), 1.0], dtype=jnp.float32)
        else:
            self.alpha = jnp.asarray(alpha, dtype=jnp.float32)

    @staticmethod
    def _pick_tile_rows(n, c, in_itemsize, vmem_limit_bytes):
        # Size by bytes: ~4 MiB of logits per tile saturates the HBM roofline;
        # keep 2x double-buffered input + ~3 (TN,C) f32 temporaries within ~60%
        # of the per-core VMEM limit (matters most on v7x's 64 MiB VMEM).
        target_in_bytes = 4 * 1024 * 1024
        per_row_in = c * in_itemsize
        per_row_total = 2 * per_row_in + 3 * c * 4
        tn_target = max(8, target_in_bytes // per_row_in)
        tn_vmem = max(8, (vmem_limit_bytes * 3 // 5) // per_row_total)
        tn = min(tn_target, tn_vmem, _round_up(n, 8))
        return max(8, (int(tn) // 8) * 8)
        # TODO(synk): for vocab-scale C (f32 C >~ 64k) add an inner C-chunked
        # online-logsumexp loop so VMEM is bounded independent of C.

    def __call__(self, logits, targets, indexes, tile_rows=None):
        assert self.size_average, "only size_average=True path implemented"
        # TODO(synk): size_average=False (per-sample loss) and update_weight
        # (in-place nn.Parameter mutation) are not implemented.
        n, c = logits.shape
        targets_2d = targets.astype(jnp.int32).reshape(n, 1)

        inv_q = 1.0 / self.q
        const2 = (self.smooth_ratio - self.k ** self.q) / self.q

        # Per-sample scale (pure gathers): weight[indexes] (* alpha[targets]).
        w = self.weight[indexes].astype(jnp.float32).reshape(n, 1)
        if self.alpha is not None:
            w = w * self.alpha[targets].astype(jnp.float32).reshape(n, 1)

        vmem_limit = _vmem_limit_bytes()
        tn = tile_rows if tile_rows is not None else self._pick_tile_rows(
            n, c, jnp.dtype(logits.dtype).itemsize, vmem_limit)
        tn = max(8, (int(tn) // 8) * 8)
        num_tiles = (n + tn - 1) // tn   # ragged tail masked in-kernel, no jnp.pad copy

        kernel = functools.partial(_truncated_loss_kernel, q=self.q, n_rows=n)

        partials = pl.pallas_call(
            kernel,
            grid=(num_tiles,),
            out_shape=jax.ShapeDtypeStruct((num_tiles, 1, 128), jnp.float32),
            in_specs=[
                pl.BlockSpec((tn, c), lambda i: (i, 0)),   # logits tile (native dtype)
                pl.BlockSpec((tn, 1), lambda i: (i, 0)),   # targets column
                pl.BlockSpec((tn, 1), lambda i: (i, 0)),   # per-sample (w/q) column
            ],
            # Each tile owns its own output block -> no cross-step carry, axis is
            # "parallel": megacore shards tiles across both TensorCores on v7x.
            out_specs=pl.BlockSpec((1, 1, 128), lambda i: (i, 0, 0)),
            compiler_params=pltpu.CompilerParams(
                dimension_semantics=("parallel",),
                vmem_limit_bytes=vmem_limit,
            ),
        )(logits, targets_2d, w * inv_q)

        # Logits-independent affine term hoisted out of the kernel:
        #   sum_i w_i*(smooth/q - const2)  -  sum_i (w_i/q)*Yg_i**q
        const_part = jnp.sum(w) * (self.smooth_ratio * inv_q - const2)
        total = const_part - jnp.sum(partials[:, 0, 0])
        return total / n   # size_average=True -> mean over the true batch size


def _reference(logits, targets, weight, indexes, q, k, smooth_ratio, alpha=None):
    p = jax.nn.softmax(logits.astype(jnp.float32), axis=1)
    yg = jnp.take_along_axis(p, targets[:, None], axis=1)
    w = weight[indexes]
    loss = (smooth_ratio - yg ** q) / q * w - (smooth_ratio - k ** q) / q * w
    if alpha is not None:
        loss = loss * alpha[targets][:, None]
    return jnp.mean(loss)


if __name__ == "__main__":
    TRAINSET = 256

    # Test 1: small single-tile f32 case.
    k1, k2, k3 = jax.random.split(jax.random.PRNGKey(0), 3)
    N, C = 8, 32
    logits = jax.random.normal(k1, (N, C), dtype=jnp.float32)
    targets = jax.random.randint(k2, (N,), 0, C, dtype=jnp.int32)
    indexes = jax.random.randint(k3, (N,), 0, TRAINSET, dtype=jnp.int32)

    mod = TruncatedLossPallas(q=0.7, k=0.5, trainset_size=TRAINSET,
                              size_average=True, smooth_ratio=1.0, alpha=None)

    out = jax.block_until_ready(mod(logits, targets, indexes))
    ref = jax.block_until_ready(
        _reference(logits, targets, mod.weight, indexes, q=0.7, k=0.5, smooth_ratio=1.0))
    assert jnp.allclose(out, ref, atol=1e-5, rtol=1e-4), (out, ref)

    # Test 2: multi-tile grid with a ragged last tile (N=20, TN=8 -> 3 tiles),
    # exercises the in-kernel row masking (no jnp.pad of logits).
    k4, k5, k6 = jax.random.split(jax.random.PRNGKey(1), 3)
    N2, C2 = 20, 32
    logits2 = jax.random.normal(k4, (N2, C2), dtype=jnp.float32)
    targets2 = jax.random.randint(k5, (N2,), 0, C2, dtype=jnp.int32)
    indexes2 = jax.random.randint(k6, (N2,), 0, TRAINSET, dtype=jnp.int32)

    out2 = jax.block_until_ready(mod(logits2, targets2, indexes2, tile_rows=8))
    ref2 = jax.block_until_ready(
        _reference(logits2, targets2, mod.weight, indexes2, q=0.7, k=0.5, smooth_ratio=1.0))
    assert jnp.allclose(out2, ref2, atol=1e-5, rtol=1e-4), (out2, ref2)

    # Test 3: bf16 logits + alpha branch + ragged tail (N=100, TN=32 -> 4 tiles).
    k7, k8, k9 = jax.random.split(jax.random.PRNGKey(2), 3)
    N3, C3 = 100, 128
    logits3 = jax.random.normal(k7, (N3, C3), dtype=jnp.float32).astype(jnp.bfloat16)
    targets3 = jax.random.randint(k8, (N3,), 0, C3, dtype=jnp.int32)
    indexes3 = jax.random.randint(k9, (N3,), 0, TRAINSET, dtype=jnp.int32)
    alpha_list = [0.5] * (C3 // 2) + [1.5] * (C3 // 2)

    mod3 = TruncatedLossPallas(q=0.7, k=0.5, trainset_size=TRAINSET,
                               size_average=True, smooth_ratio=1.0, alpha=alpha_list)
    out3 = jax.block_until_ready(mod3(logits3, targets3, indexes3, tile_rows=32))
    ref3 = jax.block_until_ready(
        _reference(logits3, targets3, mod3.weight, indexes3, q=0.7, k=0.5,
                   smooth_ratio=1.0, alpha=jnp.asarray(alpha_list, jnp.float32)))
    assert jnp.allclose(out3, ref3, atol=1e-5, rtol=1e-4), (out3, ref3)

    print("KERNEL_OK")
</pallas_src>

<mosaic_0001>
module attributes {stable_mosaic.version = 11 : i64} {
  func.func @_truncated_loss_kernel(%arg0: i32, %arg1: memref<8x32xf32, #tpu.memory_space<vmem>>, %arg2: memref<8x1xi32, #tpu.memory_space<vmem>>, %arg3: memref<8x1xf32, #tpu.memory_space<vmem>>, %arg4: memref<1x1x128xf32, #tpu.memory_space<vmem>>) attributes {dimension_semantics = [#tpu.dimension_semantics<parallel>], iteration_bounds = array<i64: 1>, scalar_prefetch = 0 : i64, scratch_operands = 0 : i64, tpu.core_type = #tpu.core_type<tc>, window_params = [{transform_indices = @transform_0, window_bounds = array<i64: 8, 32>}, {transform_indices = @transform_1, window_bounds = array<i64: 8, 1>}, {transform_indices = @transform_2, window_bounds = array<i64: 8, 1>}, {transform_indices = @transform_3, window_bounds = array<i64: 1, 1, 128>}]} {
    %c0 = arith.constant 0 : index
    %c0_0 = arith.constant 0 : index
    %0 = vector.load %arg1[%c0, %c0_0] : memref<8x32xf32, #tpu.memory_space<vmem>>, vector<8x32xf32>
    %cst = arith.constant dense<0xFF800000> : vector<8xf32>
    %1 = vector.multi_reduction <maximumf>, %0, %cst [1] : vector<8x32xf32> to vector<8xf32>
    %2 = vector.shape_cast %1 : vector<8xf32> to vector<8x1xf32>
    %c0_1 = arith.constant 0 : index
    %c0_2 = arith.constant 0 : index
    %3 = vector.load %arg2[%c0_1, %c0_2] : memref<8x1xi32, #tpu.memory_space<vmem>>, vector<8x1xi32>
    %4 = tpu.iota {dimensions = array<i32: 1>} : vector<1x32xi32>
    %5 = vector.broadcast %4 : vector<1x32xi32> to vector<8x32xi32>
    %6 = vector.broadcast %3 : vector<8x1xi32> to vector<8x32xi32>
    %7 = arith.cmpi eq, %5, %6 : vector<8x32xi32>
    %cst_3 = arith.constant 0.000000e+00 : f32
    %8 = vector.broadcast %cst_3 : f32 to vector<8x32xf32>
    %9 = arith.select %7, %0, %8 : vector<8x32xi1>, vector<8x32xf32>
    %cst_4 = arith.constant dense<0.000000e+00> : vector<8xf32>
    %10 = vector.multi_reduction <add>, %9, %cst_4 [1] : vector<8x32xf32> to vector<8xf32>
    %11 = vector.shape_cast %10 : vector<8xf32> to vector<8x1xf32>
    %12 = vector.broadcast %2 : vector<8x1xf32> to vector<8x32xf32>
    %13 = arith.subf %0, %12 : vector<8x32xf32>
    %14 = math.exp %13 : vector<8x32xf32>
    %cst_5 = arith.constant dense<0.000000e+00> : vector<8xf32>
    %15 = vector.multi_reduction <add>, %14, %cst_5 [1] : vector<8x32xf32> to vector<8xf32>
    %16 = vector.shape_cast %15 : vector<8xf32> to vector<8x1xf32>
    %17 = arith.subf %11, %2 : vector<8x1xf32>
    %18 = math.log %16 : vector<8x1xf32>
    %19 = arith.subf %17, %18 : vector<8x1xf32>
    %cst_6 = arith.constant 0.699999988 : f32
    %20 = vector.broadcast %cst_6 : f32 to vector<8x1xf32>
    %21 = arith.mulf %20, %19 : vector<8x1xf32>
    %22 = math.exp %21 : vector<8x1xf32>
    %c0_7 = arith.constant 0 : index
    %c0_8 = arith.constant 0 : index
    %23 = vector.load %arg3[%c0_7, %c0_8] : memref<8x1xf32, #tpu.memory_space<vmem>>, vector<8x1xf32>
    %24 = arith.mulf %23, %22 : vector<8x1xf32>
    %c8_i32 = arith.constant 8 : i32
    %25 = arith.muli %arg0, %c8_i32 : i32
    %26 = tpu.iota {dimensions = array<i32: 0>} : vector<8x1xi32>
    %27 = vector.broadcast %25 : i32 to vector<8x1xi32>
    %28 = arith.addi %27, %26 : vector<8x1xi32>
    %c8_i32_9 = arith.constant 8 : i32
    %29 = vector.broadcast %c8_i32_9 : i32 to vector<8x1xi32>
    %30 = arith.cmpi slt, %28, %29 : vector<8x1xi32>
    %cst_10 = arith.constant 0.000000e+00 : f32
    %31 = vector.broadcast %cst_10 : f32 to vector<8x1xf32>
    %32 = arith.select %30, %24, %31 : vector<8x1xi1>, vector<8x1xf32>
    %cst_11 = arith.constant 0.000000e+00 : f32
    %33 = vector.broadcast %cst_11 : f32 to vector<1x1x128xf32>
    %34 = vector.shape_cast %32 : vector<8x1xf32> to vector<1x8x1xf32>
    %cst_12 = arith.constant dense<0.000000e+00> : vector<1xf32>
    %35 = vector.multi_reduction <add>, %34, %cst_12 [1, 2] : vector<1x8x1xf32> to vector<1xf32>
    %36 = vector.shape_cast %35 : vector<1xf32> to vector<1x1x1xf32>
    %37 = vector.extract %36[0, 0, 0] : f32 from vector<1x1x1xf32>
    %38 = vector.broadcast %37 : f32 to vector<1x1x128xf32>
    %39 = arith.addf %33, %38 : vector<1x1x128xf32>
    %c0_13 = arith.constant 0 : index
    %c0_14 = arith.constant 0 : index
    %c0_15 = arith.constant 0 : index
    %40 = vector.load %arg4[%c0_13, %c0_14, %c0_15] : memref<1x1x128xf32, #tpu.memory_space<vmem>>, vector<1x1x128xf32>
    tpu.vector_store %arg4[%c0_13, %c0_14, %c0_15], %39 {strides = array<i32>} : memref<1x1x128xf32, #tpu.memory_space<vmem>>, vector<1x1x128xf32>,
    return
  }
  func.func @transform_0(%arg0: i32) -> (i32, i32) {
    %c0_i32 = arith.constant 0 : i32
    %c0_i32_0 = arith.constant 0 : i32
    return %arg0, %c0_i32 : i32, i32
  }
  func.func @transform_1(%arg0: i32) -> (i32, i32) {
    %c0_i32 = arith.constant 0 : i32
    %c0_i32_0 = arith.constant 0 : i32
    return %arg0, %c0_i32 : i32, i32
  }
  func.func @transform_2(%arg0: i32) -> (i32, i32) {
    %c0_i32 = arith.constant 0 : i32
    %c0_i32_0 = arith.constant 0 : i32
    return %arg0, %c0_i32 : i32, i32
  }
  func.func @transform_3(%arg0: i32) -> (i32, i32, i32) {
    %c0_i32 = arith.constant 0 : i32
    %c0_i32_0 = arith.constant 0 : i32
    %c0_i32_1 = arith.constant 0 : i32
    return %arg0, %c0_i32, %c0_i32_0 : i32, i32, i32
  }
}

</mosaic_0001>

<bundles_post_ra>
// kernel: tpu_custom_call.1
= control target key start
LH: loop header
LB: loop body
LE: loop exit
PB: predicated region body
PF: predicated region fallthrough
CT: control target
= control target key end

     0   :  { %vm16_vm0 = vcmask 261120   ;;  %s151_s0 = inlined_call_operand.vmem [shape: f32[8,32], index: 0, kind: input, shape index: {}]   ;;  %s152_s1 = inlined_call_operand.vmem [shape: s32[8,1], index: 1, kind: input, shape index: {}]   ;;  %s153_s2 = inlined_call_operand.vmem [shape: f32[8,1], index: 2, kind: input, shape index: {}]   ;;  %s154_s3 = inlined_call_operand.hbm [shape: f32[1,1,128], index: 3, kind: output, shape index: {}]  }
   0x1   :  { %v15_v0 = vld [vmem:[%s151_s0] sm:$0xff] }
   0x2   :  { %8 = vsyncpa [#allocation3], 0  ;;  %v17_v1 = vsel %vm16_vm0, %v15_v0, -inf  ;;  %v114_v2 = vmov 0   ;;  %v20_v3 = vld [vmem:[%s152_s1] sm:$0xff]  ;;  %v21_v7 = vlaneseq  ;;  %vm53_vm2 = vcmask 7168  }
   0x3   :  { %85 = vset.pattern.permute.xlu0 %v114_v2  ;;  %v44_v22 = vld [vmem:[%s153_s2] sm:$0xff]  ;;  %s115_s16 = smov [#allocation2]  }
   0x4   :  { %18 = vmax.xlane.f32.xlu0 %v17_v1  ;;  %v22_v8 = vand.u32 127, %v21_v7  ;;  %s73_s17 = sshll.u32 %s115_s16, 4  ;;  %s74_s17 = int_to_ptr.vmem [resolvable:$true] %s73_s17 }
   0x5   :  { %s92_s2 = scalar_lea.vmem %s74_s17, 16  ;;  %s96_s19 = scalar_lea.vmem %s74_s17, 32 }
   0x6   :  { %p93_p0 = scmp.ne.s32.totalorder %s74_s17, %s92_s2  ;;  %p97_p1 = scmp.lt.s32.totalorder %s74_s17, %s74_s17 }
   0x7   :  { %p98_p2 = scmp.lt.s32.totalorder %s96_s19, %s92_s2 }
   0x9   :  { %p99_p3 = por %p98_p2, %p97_p1 }
   0xb   :  { %p100_p4 = pnand %p99_p3, %p93_p0 }
  0x1a   :  { %24 = vperm.xlu0 %85, %v20_v3  }
  0x8d   :  { %v19_v4 = vpop.xlane.xlu0 %18 }
  0x8e   :  { %v31_v5 = vsub.f32 %v15_v0, %v19_v4 }
  0x90   :  { %v32_v6 = vmul.f32 1.442695, %v31_v5 }
  0x92   :  { %86 = vpow2.f32 %v32_v6 }
  0x95   :  { %v25_v9 = vpop.permute.xlu0 %24 }
  0x96   :  { %vm26_vm1 = vcmp.eq.s32.totalorder %v22_v8, %v25_v9 }
  0x97   :  { %v27_v11 = vsel %vm26_vm1, %v15_v0, 0.0 }
  0x98   :  { %v28_v13 = vsel %vm16_vm0, %v27_v11, 0.0 }
  0x9f   :  { %v87_v10 = vpop.eup %86 }
  0xa0   :  { %v34_v12 = vsel %vm16_vm0, %v87_v10, 0.0 }
  0xa1   :  { %35 = vadd.xlane.f32.xlu1 %v34_v12 }
  0xa5   :  { %29 = vadd.xlane.f32.xlu1 %v28_v13 }
 0x12a   :  { %v36_v14 = vpop.xlane.xlu1 %35 }
 0x12b   :  { %88 = vlog2.f32 %v36_v14 }
 0x12e   :  { %v30_v15 = vpop.xlane.xlu1 %29 }
 0x12f   :  { %v37_v18 = vsub.f32 %v30_v15, %v19_v4 }
 0x138   :  { %v89_v16 = vpop.eup %88 }
 0x139   :  { %v39_v17 = vmul.f32 0.6931472, %v89_v16 }
 0x13b   :  { %v40_v19 = vsub.f32 %v37_v18, %v39_v17 }
 0x13d   :  { %v41_v20 = vmul.f32 0.7, %v40_v19 }
 0x13f   :  { %v42_v21 = vmul.f32 1.442695, %v41_v20 }
 0x141   :  { %90 = vpow2.f32 %v42_v21 }
 0x14e   :  { %v91_v23 = vpop.eup %90 }
 0x14f   :  { %v45_v24 = vmul.f32 %v91_v23, %v44_v22 }
 0x151   :  { %v54_v25 = vsel %vm53_vm2, %v45_v24, 0.0 }
 0x152   :  { %55 = vadd.xlane.f32.xlu1 %v54_v25 }
 0x1db   :  { %v56_v26 = vpop.xlane.xlu1 %55 }
 0x1dc   :  { %v57_v27 = vrot.slane %v56_v26, 4 }
 0x1de   :  { %v58_v28 = vadd.f32 %v57_v27, %v56_v26 }
 0x1e0   :  { %v59_v29 = vrot.slane %v58_v28, 2 }
 0x1e2   :  { %v60_v30 = vadd.f32 %v59_v29, %v58_v28 }
 0x1e4   :  { %v61_v31 = vrot.slane %v60_v30, 1 }
 0x1e6   :  { %v62_v32 = vadd.f32 %v61_v31, %v60_v30 }
 0x1e8   :  { %81 = vpush %v62_v32 }
 0x219   :  { %s82_s18 = spop %81 }
 0x21a   :  { %v64_v33 = vstv %s82_s18 }
 0x21b   :  { %66 = vst [vmem:[#allocation2] sm:$0x1] %v64_v33 }
 0x21c   :  { %103 = shalt.err (!%p100_p4)
}
 0x21d   :  { %76 = dma.vmem_to_hbm [thread:$0]  %s74_s17, 16, %s154_s3, [#allocation3]  }
 0x21e   :  { %112 = dma.done.wait [#allocation3], 16  }
 0x21f   :  { %113 = vsyncadd [#allocation3], 4294967280 }
 0x220   :  { %80 = vsyncpa [#allocation3], 1 }

</bundles_post_ra>
